<compile_context>
chip_gen: v7x
topology: tpu7x:2x2x1
jax: 0.10.0
libtpu: 0.0.40
codegen_flags: <defaults>
</compile_context>

<pallas_src>
import functools

import jax
import jax.numpy as jnp
from jax import lax
from jax.experimental import pallas as pl
from jax.experimental.pallas import tpu as pltpu


def conv3x3_silu_kernel(w_ref, b_ref, x_ref, out_ref, *, img_w: int):
    """Fused 3x3 same-conv (C=1) + x*sigmoid(x).

    w_ref:   (9,)           f32 SMEM -- conv weight, row-major [dy*3 + dx]
    b_ref:   (1,)           f32 SMEM -- conv bias
    x_ref:   (H, tile_n*W)  f32 VMEM -- images packed along lanes (lane = n*W + w)
    out_ref: (H, tile_n*W)  f32 VMEM
    """
    H, NW = out_ref.shape
    x = x_ref[...]

    # ---- Hoisted validity masks (built once, applied as f32 multiplies). ----
    # They realize both the zero padding (padding=1) and the seams between
    # images packed along the lane axis, and absorb the roll wrap-around.
    row = lax.broadcasted_iota(jnp.int32, (H, NW), 0)
    col = lax.broadcasted_iota(jnp.int32, (H, NW), 1) % img_w
    col_mask = {-1: (col >= 1).astype(jnp.float32),            # needs col-1 >= 0
                +1: (col <= img_w - 2).astype(jnp.float32)}     # needs col+1 <  W
    row_mask = {-1: (row >= 1).astype(jnp.float32),             # needs row-1 >= 0
                +1: (row <= H - 2).astype(jnp.float32)}         # needs row+1 <  H

    # ---- Hoisted scalar reads (SMEM) -- JAX does not CSE these for us. ----
    w = [w_ref[k] for k in range(9)]
    bias = b_ref[0]

    acc = jnp.zeros((H, NW), jnp.float32)
    # dx direction: build 3 lane-shifted slabs once, reuse across the 3 dy taps.
    for sx in (-1, 0, 1):
        if sx == 0:
            slab = x
        else:
            # slab[h, l] = x[h, l + sx] inside the image, 0 at seams/borders.
            slab = pltpu.roll(x, (-sx) % NW, axis=1) * col_mask[sx]
        # dy direction: 3 sublane shifts per slab.
        for sy in (-1, 0, 1):
            if sy == 0:
                shifted = slab
            else:
                shifted = pltpu.roll(slab, (-sy) % H, axis=0) * row_mask[sy]
            acc = acc + shifted * w[(sy + 1) * 3 + (sx + 1)]
    acc = acc + bias

    # MYSELU forward: x * sigmoid(x), with sigmoid(x) = 0.5*(1 + tanh(x/2)).
    # tanh is one EUP op on an otherwise-idle slot (kernel is VALU-bound).
    out_ref[...] = (acc * (0.5 * jnp.tanh(0.5 * acc) + 0.5)).astype(out_ref.dtype)


def _pick_tile_n(N: int, W: int) -> int:
    """Images per block along the packed lane axis.

    Prefers the smallest divisor of N whose lane width (tile_n*W) is a
    multiple of 128 (unmasked vst), which also gives >= 2 grid steps whenever
    possible so v7x can shard the "parallel" axis across its two TensorCores.
    For very large H one would additionally cap block bytes (~2-8 MiB) and
    tile rows with a 1-row halo; not needed at these sizes.
    """
    tile_n = N
    for d in range(1, N + 1):
        if N % d == 0 and (d * W) % 128 == 0:
            tile_n = d
            break
    if tile_n == N and N % 2 == 0:
        tile_n = N // 2  # no 128-aligned split exists: split anyway for megacore
    return tile_n


@jax.jit
def model_forward(x, conv_weight, conv_bias):
    """x: (N, 1, H, W) f32 NCHW -> (N, 1, H, W) f32."""
    N, C, H, W = x.shape
    assert C == 1
    # Lane-dense packing (layout plumbing only): (N,1,H,W) -> (H, N*W).
    # In a larger model one would keep this packed layout end-to-end instead
    # of paying the repack HBM round-trip on both sides of the kernel.
    x_packed = x.reshape(N, H, W).transpose(1, 0, 2).reshape(H, N * W)

    tile_n = _pick_tile_n(N, W)
    lanes = tile_n * W
    grid = (N // tile_n,)

    out_packed = pl.pallas_call(
        functools.partial(conv3x3_silu_kernel, img_w=W),
        out_shape=jax.ShapeDtypeStruct((H, N * W), x.dtype),
        grid=grid,
        in_specs=[
            pl.BlockSpec(memory_space=pltpu.MemorySpace.SMEM),  # (9,) weight
            pl.BlockSpec(memory_space=pltpu.MemorySpace.SMEM),  # (1,) bias
            pl.BlockSpec((H, lanes), lambda i: (0, i)),
        ],
        out_specs=pl.BlockSpec((H, lanes), lambda i: (0, i)),
        compiler_params=pltpu.CompilerParams(
            dimension_semantics=("parallel",)),
    )(conv_weight.reshape(9), conv_bias, x_packed)

    return out_packed.reshape(H, N, W).transpose(1, 0, 2).reshape(N, 1, H, W)


if __name__ == "__main__":
    key = jax.random.PRNGKey(0)

    # Parameters exactly as Model.__init__:
    #   conv = nn.Conv2d(1, 1, 3, padding=1); weight.fill_(1); bias.fill_(0)
    conv_weight = jnp.ones((1, 1, 3, 3), dtype=jnp.float32)
    conv_bias = jnp.zeros((1,), dtype=jnp.float32)
    # TODO(synk): MYSELU(3).param = arange(3) does not affect the forward math;
    # kept only for parity with the module definition.
    myselu_param = jnp.arange(3, dtype=jnp.float32)  # noqa: F841

    # Small input consistent with the module (Conv2d(1,1,...) => C=1).
    # N=16, W=16 -> packed lane axis 256, tiled into 2 blocks of 128 lanes
    # (exercises the parallel grid and lane-dense stores).
    N, C, H, W = 16, 1, 16, 16
    k_x, k_w = jax.random.split(key)
    x = jax.random.normal(k_x, (N, C, H, W), dtype=jnp.float32)

    def reference(xx, w, b):
        conv = lax.conv_general_dilated(
            xx, w, window_strides=(1, 1), padding=((1, 1), (1, 1)),
            dimension_numbers=("NCHW", "OIHW", "NCHW")) + b.reshape(1, 1, 1, 1)
        return conv * (1.0 / (1.0 + jnp.exp(-conv)))

    # Run with the module's actual (all-ones) weights.
    y = jax.block_until_ready(model_forward(x, conv_weight, conv_bias))
    assert y.shape == (N, C, H, W)
    assert jnp.allclose(y, reference(x, conv_weight, conv_bias),
                        atol=1e-5, rtol=1e-5)

    # Extra check with an asymmetric random kernel (exercises every stencil tap).
    w_rnd = jax.random.normal(k_w, (1, 1, 3, 3), dtype=jnp.float32)
    b_rnd = 0.25 * jnp.ones((1,), jnp.float32)
    y2 = jax.block_until_ready(model_forward(x, w_rnd, b_rnd))
    assert jnp.allclose(y2, reference(x, w_rnd, b_rnd), atol=1e-5, rtol=1e-5)

    print("KERNEL_OK")
</pallas_src>

<mosaic_0001>
module attributes {stable_mosaic.version = 11 : i64} {
  func.func @conv3x3_silu_kernel(%arg0: i32, %arg1: memref<9xf32, #tpu.memory_space<smem>>, %arg2: memref<1xf32, #tpu.memory_space<smem>>, %arg3: memref<16x128xf32, #tpu.memory_space<vmem>>, %arg4: memref<16x128xf32, #tpu.memory_space<vmem>>) attributes {dimension_semantics = [#tpu.dimension_semantics<parallel>], iteration_bounds = array<i64: 2>, scalar_prefetch = 0 : i64, scratch_operands = 0 : i64, tpu.core_type = #tpu.core_type<tc>, window_params = [{transform_indices = @transform_0, window_bounds = array<i64: 9>}, {transform_indices = @transform_1, window_bounds = array<i64: 1>}, {transform_indices = @transform_2, window_bounds = array<i64: 16, 128>}, {transform_indices = @transform_3, window_bounds = array<i64: 16, 128>}]} {
    %c0 = arith.constant 0 : index
    %c0_0 = arith.constant 0 : index
    %0 = vector.load %arg3[%c0, %c0_0] : memref<16x128xf32, #tpu.memory_space<vmem>>, vector<16x128xf32>
    %1 = tpu.iota {dimensions = array<i32: 0>} : vector<16x128xi32>
    %2 = tpu.iota {dimensions = array<i32: 1>} : vector<16x128xi32>
    %c16_i32 = arith.constant 16 : i32
    %c0_i32 = arith.constant 0 : i32
    %3 = arith.cmpi eq, %c16_i32, %c0_i32 : i32
    %c1_i32 = arith.constant 1 : i32
    %4 = arith.select %3, %c1_i32, %c16_i32 : i32
    %5 = vector.broadcast %4 : i32 to vector<16x128xi32>
    %6 = arith.remsi %2, %5 : vector<16x128xi32>
    %c0_i32_1 = arith.constant 0 : i32
    %7 = vector.broadcast %c0_i32_1 : i32 to vector<16x128xi32>
    %8 = arith.cmpi ne, %6, %7 : vector<16x128xi32>
    %c0_i32_2 = arith.constant 0 : i32
    %9 = vector.broadcast %c0_i32_2 : i32 to vector<16x128xi32>
    %10 = arith.cmpi slt, %6, %9 : vector<16x128xi32>
    %c0_i32_3 = arith.constant 0 : i32
    %11 = arith.cmpi slt, %4, %c0_i32_3 : i32
    %12 = vector.broadcast %11 : i1 to vector<16x128xi1>
    %13 = vector.broadcast %12 : vector<16x128xi1> to vector<16x128xi1>
    %14 = arith.xori %10, %13 : vector<16x128xi1>
    %15 = arith.andi %14, %8 : vector<16x128xi1>
    %16 = vector.broadcast %4 : i32 to vector<16x128xi32>
    %17 = arith.addi %6, %16 : vector<16x128xi32>
    %18 = arith.select %15, %17, %6 : vector<16x128xi1>, vector<16x128xi32>
    %c1_i32_4 = arith.constant 1 : i32
    %19 = vector.broadcast %c1_i32_4 : i32 to vector<16x128xi32>
    %20 = arith.cmpi sge, %18, %19 : vector<16x128xi32>
    %21 = arith.extui %20 : vector<16x128xi1> to vector<16x128xi32>
    %22 = arith.sitofp %21 : vector<16x128xi32> to vector<16x128xf32>
    %c14_i32 = arith.constant 14 : i32
    %23 = vector.broadcast %c14_i32 : i32 to vector<16x128xi32>
    %24 = arith.cmpi sle, %18, %23 : vector<16x128xi32>
    %25 = arith.extui %24 : vector<16x128xi1> to vector<16x128xi32>
    %26 = arith.sitofp %25 : vector<16x128xi32> to vector<16x128xf32>
    %c1_i32_5 = arith.constant 1 : i32
    %27 = vector.broadcast %c1_i32_5 : i32 to vector<16x128xi32>
    %28 = arith.cmpi sge, %1, %27 : vector<16x128xi32>
    %29 = arith.extui %28 : vector<16x128xi1> to vector<16x128xi32>
    %30 = arith.sitofp %29 : vector<16x128xi32> to vector<16x128xf32>
    %c14_i32_6 = arith.constant 14 : i32
    %31 = vector.broadcast %c14_i32_6 : i32 to vector<16x128xi32>
    %32 = arith.cmpi sle, %1, %31 : vector<16x128xi32>
    %33 = arith.extui %32 : vector<16x128xi1> to vector<16x128xi32>
    %34 = arith.sitofp %33 : vector<16x128xi32> to vector<16x128xf32>
    %c0_7 = arith.constant 0 : index
    %35 = memref.load %arg1[%c0_7] : memref<9xf32, #tpu.memory_space<smem>>
    %c1 = arith.constant 1 : index
    %36 = memref.load %arg1[%c1] : memref<9xf32, #tpu.memory_space<smem>>
    %c2 = arith.constant 2 : index
    %37 = memref.load %arg1[%c2] : memref<9xf32, #tpu.memory_space<smem>>
    %c3 = arith.constant 3 : index
    %38 = memref.load %arg1[%c3] : memref<9xf32, #tpu.memory_space<smem>>
    %c4 = arith.constant 4 : index
    %39 = memref.load %arg1[%c4] : memref<9xf32, #tpu.memory_space<smem>>
    %c5 = arith.constant 5 : index
    %40 = memref.load %arg1[%c5] : memref<9xf32, #tpu.memory_space<smem>>
    %c6 = arith.constant 6 : index
    %41 = memref.load %arg1[%c6] : memref<9xf32, #tpu.memory_space<smem>>
    %c7 = arith.constant 7 : index
    %42 = memref.load %arg1[%c7] : memref<9xf32, #tpu.memory_space<smem>>
    %c8 = arith.constant 8 : index
    %43 = memref.load %arg1[%c8] : memref<9xf32, #tpu.memory_space<smem>>
    %c0_8 = arith.constant 0 : index
    %44 = memref.load %arg2[%c0_8] : memref<1xf32, #tpu.memory_space<smem>>
    %cst = arith.constant 0.000000e+00 : f32
    %45 = vector.broadcast %cst : f32 to vector<16x128xf32>
    %c1_i32_9 = arith.constant 1 : i32
    %46 = tpu.dynamic_rotate %0 by %c1_i32_9 dim 1 : vector<16x128xf32>, i32 -> vector<16x128xf32>
    %47 = arith.mulf %46, %22 : vector<16x128xf32>
    %c1_i32_10 = arith.constant 1 : i32
    %48 = tpu.dynamic_rotate %47 by %c1_i32_10 dim 0 : vector<16x128xf32>, i32 -> vector<16x128xf32>
    %49 = arith.mulf %48, %30 : vector<16x128xf32>
    %50 = vector.broadcast %35 : f32 to vector<16x128xf32>
    %51 = arith.mulf %49, %50 : vector<16x128xf32>
    %52 = arith.addf %45, %51 : vector<16x128xf32>
    %53 = vector.broadcast %38 : f32 to vector<16x128xf32>
    %54 = arith.mulf %47, %53 : vector<16x128xf32>
    %55 = arith.addf %52, %54 : vector<16x128xf32>
    %c15_i32 = arith.constant 15 : i32
    %56 = tpu.dynamic_rotate %47 by %c15_i32 dim 0 : vector<16x128xf32>, i32 -> vector<16x128xf32>
    %57 = arith.mulf %56, %34 : vector<16x128xf32>
    %58 = vector.broadcast %41 : f32 to vector<16x128xf32>
    %59 = arith.mulf %57, %58 : vector<16x128xf32>
    %60 = arith.addf %55, %59 : vector<16x128xf32>
    %c1_i32_11 = arith.constant 1 : i32
    %61 = tpu.dynamic_rotate %0 by %c1_i32_11 dim 0 : vector<16x128xf32>, i32 -> vector<16x128xf32>
    %62 = arith.mulf %61, %30 : vector<16x128xf32>
    %63 = vector.broadcast %36 : f32 to vector<16x128xf32>
    %64 = arith.mulf %62, %63 : vector<16x128xf32>
    %65 = arith.addf %60, %64 : vector<16x128xf32>
    %66 = vector.broadcast %39 : f32 to vector<16x128xf32>
    %67 = arith.mulf %0, %66 : vector<16x128xf32>
    %68 = arith.addf %65, %67 : vector<16x128xf32>
    %c15_i32_12 = arith.constant 15 : i32
    %69 = tpu.dynamic_rotate %0 by %c15_i32_12 dim 0 : vector<16x128xf32>, i32 -> vector<16x128xf32>
    %70 = arith.mulf %69, %34 : vector<16x128xf32>
    %71 = vector.broadcast %42 : f32 to vector<16x128xf32>
    %72 = arith.mulf %70, %71 : vector<16x128xf32>
    %73 = arith.addf %68, %72 : vector<16x128xf32>
    %c127_i32 = arith.constant 127 : i32
    %74 = tpu.dynamic_rotate %0 by %c127_i32 dim 1 : vector<16x128xf32>, i32 -> vector<16x128xf32>
    %75 = arith.mulf %74, %26 : vector<16x128xf32>
    %c1_i32_13 = arith.constant 1 : i32
    %76 = tpu.dynamic_rotate %75 by %c1_i32_13 dim 0 : vector<16x128xf32>, i32 -> vector<16x128xf32>
    %77 = arith.mulf %76, %30 : vector<16x128xf32>
    %78 = vector.broadcast %37 : f32 to vector<16x128xf32>
    %79 = arith.mulf %77, %78 : vector<16x128xf32>
    %80 = arith.addf %73, %79 : vector<16x128xf32>
    %81 = vector.broadcast %40 : f32 to vector<16x128xf32>
    %82 = arith.mulf %75, %81 : vector<16x128xf32>
    %83 = arith.addf %80, %82 : vector<16x128xf32>
    %c15_i32_14 = arith.constant 15 : i32
    %84 = tpu.dynamic_rotate %75 by %c15_i32_14 dim 0 : vector<16x128xf32>, i32 -> vector<16x128xf32>
    %85 = arith.mulf %84, %34 : vector<16x128xf32>
    %86 = vector.broadcast %43 : f32 to vector<16x128xf32>
    %87 = arith.mulf %85, %86 : vector<16x128xf32>
    %88 = arith.addf %83, %87 : vector<16x128xf32>
    %89 = vector.broadcast %44 : f32 to vector<16x128xf32>
    %90 = arith.addf %88, %89 : vector<16x128xf32>
    %cst_15 = arith.constant 5.000000e-01 : f32
    %91 = vector.broadcast %cst_15 : f32 to vector<16x128xf32>
    %92 = arith.mulf %91, %90 : vector<16x128xf32>
    %93 = math.tanh %92 : vector<16x128xf32>
    %cst_16 = arith.constant 5.000000e-01 : f32
    %94 = vector.broadcast %cst_16 : f32 to vector<16x128xf32>
    %95 = arith.mulf %94, %93 : vector<16x128xf32>
    %cst_17 = arith.constant 5.000000e-01 : f32
    %96 = vector.broadcast %cst_17 : f32 to vector<16x128xf32>
    %97 = arith.addf %95, %96 : vector<16x128xf32>
    %98 = arith.mulf %90, %97 : vector<16x128xf32>
    %c0_18 = arith.constant 0 : index
    %c0_19 = arith.constant 0 : index
    %99 = vector.load %arg4[%c0_18, %c0_19] : memref<16x128xf32, #tpu.memory_space<vmem>>, vector<16x128xf32>
    tpu.vector_store %arg4[%c0_18, %c0_19], %98 {strides = array<i32>} : memref<16x128xf32, #tpu.memory_space<vmem>>, vector<16x128xf32>,
    return
  }
  func.func @transform_0(%arg0: i32) -> i32 {
    %c0_i32 = arith.constant 0 : i32
    %c0_i32_0 = arith.constant 0 : i32
    return %c0_i32 : i32
  }
  func.func @transform_1(%arg0: i32) -> i32 {
    %c0_i32 = arith.constant 0 : i32
    %c0_i32_0 = arith.constant 0 : i32
    return %c0_i32 : i32
  }
  func.func @transform_2(%arg0: i32) -> (i32, i32) {
    %c0_i32 = arith.constant 0 : i32
    %c0_i32_0 = arith.constant 0 : i32
    return %c0_i32, %arg0 : i32, i32
  }
  func.func @transform_3(%arg0: i32) -> (i32, i32) {
    %c0_i32 = arith.constant 0 : i32
    %c0_i32_0 = arith.constant 0 : i32
    return %c0_i32, %arg0 : i32, i32
  }
}

</mosaic_0001>

<bundles_post_ra>
// kernel: model_forward.1
= control target key start
LH: loop header
LB: loop body
LE: loop exit
PB: predicated region body
PF: predicated region fallthrough
CT: control target
= control target key end

     0   :  { %s789_s0 = inlined_call_operand.vmem [shape: f32[9], index: 0, kind: input, shape index: {}]   ;;  %s790_s1 = inlined_call_operand.<no memory space> [shape: f32[1], index: 1, kind: input, shape index: {}]   ;;  %s791_s2 = inlined_call_operand.vmem [shape: f32[16,256], index: 2, kind: input, shape index: {}]   ;;  %s792_s3 = inlined_call_operand.vmem [shape: f32[16,256], index: 3, kind: output, shape index: {}]  }
   0x1   :  { %8 = sst [smem:[#allocation2]] %s790_s1 }
   0x2   :  { %9 = vsyncpa [#allocation4], 0  ;;  %s627_s14 = smov 0   ;;  %s629_s15 = smov 0  }
   0x3   :  { %s631_s16 = smov 0  }
   0x4 LB: > { %s643_s1 = sadd.s32 4294967295, %s598_s16   ;;  %s646_s17 = sadd.s32 1, %s598_s16   ;;  %s598_s16 = sphi %s631_s16, %s799_s16   ;;  %s594_s15 = sphi %s629_s15, %s798_s15   ;;  %s590_s14 = sphi %s627_s14, %s797_s14  }
   0x5   : > { %s61_s18 = ssub.s32 %s598_s16, %s646_s17  ;;  %s64_s19 = sadd.s32 1, %s594_s15 }
   0x6   : > { %p62_p0 = scmp.eq.s32.totalorder %s61_s18, 0  ;;  %p71_p1 = scmp.ne.s32.totalorder %s594_s15, %s590_s14 }
   0x7   : > { %p72_p2 = scmp.eq.s32.totalorder %s598_s16, 0  ;;  %p101_p3 = scmp.eq.s32.totalorder %s643_s1, 1 }
   0x8   : > { %s656_s20 = scalar_select %p62_p0, %s594_s15, %s64_s19  }
   0x9   : > { %p658_p4 = por %p72_p2, %p71_p1  ;;  %p662_p5 = por %p101_p3, %p71_p1 }
   0xa   : > { %p490_p6 = scmp.ge.s32.totalorder %s598_s16, 1  ;;  %p114_p7 = scmp.lt.s32.totalorder %s598_s16, 3 }
   0xb   : > { %s794_s22 = scalar_select %p662_p5, 1, 0 }
   0xc   : > { %p523_p8 = scmp.eq.s32.totalorder %s643_s1, 0  ;;  %p669_p9 = pnand %p490_p6, %p114_p7 }
   0xd   : > { %s127_s26 = sshll.u32 %s789_s0, 4  ;;  %s128_s26 = int_to_ptr.vmem [resolvable:$true] %s127_s26 }
   0xe   : > { %p519_p10 = pneg %p669_p9  ;;  %s557_s27 = scalar_lea.vmem %s128_s26, 16 }
   0xf   : > { %p558_p12 = scmp.ne.s32.totalorder %s128_s26, %s557_s27  ;;  %p565_p2 = scmp.lt.s32.totalorder %s128_s26, %s128_s26 }
  0x10   : > { %p520_p11 = pnand %p523_p8, %p519_p10  ;;  %p566_p3 = scmp.lt.s32.totalorder %s557_s27, %s557_s27 }
  0x12   : > { %p559_p13 = pneg %p520_p11  ;;  %p567_p6 = por %p566_p3, %p565_p2 }
  0x14   : > { %p560_p0 = pnand %p559_p13, %p558_p12 }
  0x16   : > { %p561_p1 = pneg %p560_p0 }
  0x18   : > { %p568_p7 = pnand %p567_p6, %p561_p1 }
  0x1a   : > { %571 = shalt.err (!%p568_p7)
}
  0x1b   : > { %s600_s28 = smov [#allocation3]   ;;  %p492_p5 = scmp.ge.s32.totalorder %s598_s16, 2 }
  0x1c   : > { %522 = dma.vmem_to_smem (!%p520_p11), %s128_s26, 16, %s600_s28, [#allocation4]  }
  0x1d   : > { %137 = sbr.rel (%p492_p5) target bundleno = 43 (0x2b), region = 24 }
  0x24   : > { %140 = sbr.rel (!%p658_p4) target bundleno = 43 (0x2b), region = 28  ;;  %s142_s29 = sand.u32 (%p658_p4), 1, %s594_s15  }
  0x25   : > { %s494_s30 = sshll.u32 (%p658_p4), %s598_s16, 3  ;;  %s493_s4 = sshll.u32 (%p658_p4), %s142_s29, 4 }
  0x26   : > { %s146_s7 = scalar_lea.vmem (%p658_p4), %s791_s2, %s494_s30  ;;  %s144_s8 = scalar_lea.vmem (%p658_p4), [#allocation5], %s493_s4 }
  0x27   : > { %v176_v0 = vld [vmem:[%s146_s7] sm:$0xff] (%p658_p4)  ;;  %v178_v1 = vld [vmem:[%s146_s7 + $0x10] sm:$0xff] (%p658_p4) }
  0x28   : > { %177 = vst [vmem:[%s144_s8] sm:$0xff] (%p658_p4), %v176_v0  ;;  %179 = vst [vmem:[%s144_s8 + $0x8] sm:$0xff] (%p658_p4), %v178_v1 }
  0x2b PF: > { %188 = sbr.rel (%p669_p9) target bundleno = 230 (0xe6), region = 66 }
  0x32   : > { %585 = dma.done.wait (%p523_p8), [#allocation4], 16  }
  0x33   : > { %587 = vsyncadd (%p523_p8), [#allocation4], 4294967280  ;;  %s195_s9 = sand.u32 1, %s590_s14  }
  0x34   : > { %s695_s10 = sshll.u32 %s195_s9, 4 }
  0x35   : > { %s197_s11 = scalar_lea.vmem [#allocation5], %s695_s10 }
  0x36   : > { %201 = sfence }
  0x37   : > { %v698_v2 = vld [vmem:[%s197_s11] sm:$0xff]  ;;  %v700_v3 = vld [vmem:[%s197_s11 + $0x8] sm:$0xff]  ;;  %v220_v4 = vlaneseq  ;;  %s601_s12 = smov 1   ;;  %s602_s13 = smov 127   ;;  %v603_v17 = vmov 0.0  }
  0x38   : > { %265 = vrot.lane.b32.xlu0 %v698_v2, %s601_s12  ;;  %v300_v5 = vrot.slane %v698_v2, 7  ;;  %v301_v6 = vrot.slane %v700_v3, 7  ;;  %327 = vrot.lane.b32.xlu1 %v698_v2, %s602_s13  ;;  %v316_v8 = vrot.slane %v698_v2, 1  ;;  %v317_v9 = vrot.slane %v700_v3, 1  ;;  %s724_s14 = sld [smem:[#allocation3 + $0x4]]  ;;  %s726_s16 = sld [smem:[#allocation3]] }
  0x39   : > { %v706_v7 = vshrl.u32 %v220_v4, 7  ;;  %v224_v14 = vand.u32 127, %v220_v4  ;;  %s729_s18 = sld [smem:[#allocation3 + $0x1]]  ;;  %s731_s19 = sld [smem:[#allocation3 + $0x3]] }
  0x3a   : > { %s733_s21 = sld [smem:[#allocation3 + $0x6]]  ;;  %s737_s23 = sld [smem:[#allocation3 + $0x7]] }
  0x3b   : > { %vm273_vm0 = vcmp.lt.s32.totalorder %v706_v7, 1  ;;  %vm290_vm1 = vcmp.lt.s32.totalorder %v706_v7, 7  ;;  %v229_v15 = vand.u32 15, %v224_v14  ;;  %v222_v16 = vadd.s32 8, %v706_v7  ;;  %s749_s24 = sld [smem:[#allocation3 + $0x2]]  ;;  %s754_s25 = sld [smem:[#allocation3 + $0x5]] }
  0x3c   : > { %267 = vrot.lane.b32.xlu0 %v700_v3, %s601_s12  ;;  %v303_v10 = vsel %vm273_vm0, %v301_v6, %v300_v5  ;;  %v302_v11 = vsel %vm273_vm0, %v300_v5, %v301_v6  ;;  %329 = vrot.lane.b32.xlu1 %v700_v3, %s602_s13  ;;  %v319_v12 = vsel %vm290_vm1, %v317_v9, %v316_v8  ;;  %vm243_vm4 = vcmp.ge.s32.totalorder %v706_v7, 1  ;;  %s757_s26 = sld [smem:[#allocation3 + $0x8]]  ;;  %s217_s28 = scalar_lea.vmem [#allocation6], %s695_s10 }
  0x3d   : > { %v722_v13 = vsel %vm290_vm1, %v316_v8, %v317_v9  ;;  %vm237_vm2 = vcmp.ge.s32.totalorder %v229_v15, 1  ;;  %vm240_vm3 = vcmp.le.s32.totalorder %v229_v15, 14  ;;  %vm250_vm5 = vcmp.le.s32.totalorder %v222_v16, 14  ;;  %s264_s27 = sld [smem:[#allocation2]]  ;;  %p796_p4 = scmp.ne.s32.totalorder %s794_s22, 0 }
  0x3e   : > { %v499_v18 = vsel %vm237_vm2, 1.0, %v603_v17  ;;  %v500_v22 = vsel %vm240_vm3, 1.0, %v603_v17  ;;  %v311_v24 = vstv %s724_s14  ;;  %v501_v25 = vsel %vm243_vm4, 1.0, %v603_v17  ;;  %s512_s29 = sshll.u32 (%p796_p4), %s643_s1, 3 }
  0x3f   : > { %v502_v28 = vsel %vm250_vm5, 1.0, %v603_v17  ;;  %v278_v30 = vstv %s726_s16  ;;  %v283_v36 = vstv %s731_s19  ;;  %v306_v37 = vstv %s729_s18  ;;  %s383_s5 = scalar_lea.vmem (%p796_p4), %s792_s3, %s512_s29 }
  0x40   : > { %v304_v38 = vmul.f32 %v501_v25, %v303_v10  ;;  %v321_v39 = vmul.f32 %v502_v28, %v319_v12  ;;  %v295_v40 = vstv %s733_s21  ;;  %v308_v49 = vmul.f32 %v306_v37, %v302_v11 }
  0x41   : > { %v313_v56 = vmul.f32 %v311_v24, %v700_v3  ;;  %v322_v58 = vstv %s737_s23  ;;  %v312_v1 = vmul.f32 %v311_v24, %v698_v2  ;;  %v339_v6 = vstv %s749_s24 }
  0x42   : > { %v307_v60 = vmul.f32 %v306_v37, %v304_v38  ;;  %v324_v5 = vmul.f32 %v322_v58, %v321_v39  ;;  %v323_v12 = vmul.f32 %v322_v58, %v722_v13 }
  0xaa   : > { %v266_v19 = vpop.permute.xlu0 %265  ;;  %v328_v20 = vpop.permute.xlu1 %327 }
  0xab   : > { %v269_v21 = vmul.f32 %v499_v18, %v266_v19  ;;  %v331_v31 = vmul.f32 %v500_v22, %v328_v20 }
  0xad   : > { %v271_v29 = vrot.slane %v269_v21, 7  ;;  %v288_v32 = vrot.slane %v269_v21, 1  ;;  %v333_v50 = vrot.slane %v331_v31, 7  ;;  %v284_v52 = vmul.f32 %v283_v36, %v269_v21 }
  0xae   : > { %v268_v23 = vpop.permute.xlu0 %267  ;;  %v330_v27 = vpop.permute.xlu1 %329  ;;  %v349_v57 = vrot.slane %v331_v31, 1 }
  0xaf   : > { %v270_v26 = vmul.f32 %v499_v18, %v268_v23  ;;  %v332_v35 = vmul.f32 %v500_v22, %v330_v27  ;;  %v344_v18 = vstv %s754_s25  ;;  %v355_v23 = vstv %s757_s26 }
  0xb1   : > { %v272_v33 = vrot.slane %v270_v26, 7  ;;  %v289_v34 = vrot.slane %v270_v26, 1  ;;  %v285_v46 = vmul.f32 %v283_v36, %v270_v26  ;;  %v334_v51 = vrot.slane %v332_v35, 7 }
  0xb2   : > { %v350_v59 = vrot.slane %v332_v35, 1  ;;  %v346_v22 = vmul.f32 %v344_v18, %v332_v35  ;;  %v345_v26 = vmul.f32 %v344_v18, %v331_v31 }
  0xb3   : > { %v274_v41 = vsel %vm273_vm0, %v271_v29, %v272_v33  ;;  %v275_v42 = vsel %vm273_vm0, %v272_v33, %v271_v29  ;;  %v292_v43 = vsel %vm290_vm1, %v289_v34, %v288_v32  ;;  %v291_v48 = vsel %vm290_vm1, %v288_v32, %v289_v34 }
  0xb4   : > { %v276_v44 = vmul.f32 %v501_v25, %v275_v42  ;;  %v280_v45 = vmul.f32 %v278_v30, %v274_v41  ;;  %v294_v47 = vmul.f32 %v502_v28, %v292_v43  ;;  %v296_v62 = vmul.f32 %v295_v40, %v291_v48 }
  0xb5   : > { %v336_v0 = vsel %vm273_vm0, %v334_v51, %v333_v50  ;;  %v335_v8 = vsel %vm273_vm0, %v333_v50, %v334_v51  ;;  %v352_v9 = vsel %vm290_vm1, %v350_v59, %v349_v57  ;;  %v351_v24 = vsel %vm290_vm1, %v349_v57, %v350_v59 }
  0xb6   : > { %v279_v53 = vmul.f32 %v278_v30, %v276_v44  ;;  %v287_v54 = vadd.f32 %v285_v46, %v280_v45  ;;  %v297_v55 = vmul.f32 %v295_v40, %v294_v47  ;;  %v337_v14 = vmul.f32 %v501_v25, %v336_v0 }
  0xb7   : > { %v341_v16 = vmul.f32 %v339_v6, %v335_v8  ;;  %v354_v17 = vmul.f32 %v502_v28, %v352_v9  ;;  %v360_v32 = vstv %s264_s27  ;;  %v356_v25 = vmul.f32 %v355_v23, %v351_v24 }
  0xb8   : > { %v286_v61 = vadd.f32 %v284_v52, %v279_v53  ;;  %v299_v63 = vadd.f32 %v297_v55, %v287_v54  ;;  %v340_v20 = vmul.f32 %v339_v6, %v337_v14 }
  0xb9   : > { %v357_v30 = vmul.f32 %v355_v23, %v354_v17 }
  0xba   : > { %v298_v4 = vadd.f32 %v296_v62, %v286_v61  ;;  %v310_v3 = vadd.f32 %v308_v49, %v299_v63 }
  0xbc   : > { %v309_v10 = vadd.f32 %v307_v60, %v298_v4  ;;  %v315_v11 = vadd.f32 %v313_v56, %v310_v3 }
  0xbe   : > { %v314_v15 = vadd.f32 %v312_v1, %v309_v10  ;;  %v326_v2 = vadd.f32 %v324_v5, %v315_v11 }
  0xc0   : > { %v325_v19 = vadd.f32 %v323_v12, %v314_v15  ;;  %v343_v21 = vadd.f32 %v341_v16, %v326_v2 }
  0xc2   : > { %v342_v27 = vadd.f32 %v340_v20, %v325_v19  ;;  %v348_v29 = vadd.f32 %v346_v22, %v343_v21 }
  0xc4   : > { %v347_v13 = vadd.f32 %v345_v26, %v342_v27  ;;  %v359_v33 = vadd.f32 %v357_v30, %v348_v29 }
  0xc6   : > { %v358_v34 = vadd.f32 %v356_v25, %v347_v13  ;;  %v362_v28 = vadd.f32 %v360_v32, %v359_v33 }
  0xc8   : > { %v361_v36 = vadd.f32 %v360_v32, %v358_v34  ;;  %v364_v37 = vmul.f32 0.5, %v362_v28 }
  0xca   : > { %v363_v38 = vmul.f32 0.5, %v361_v36  ;;  %553 = vtanh.f32 %v364_v37 }
  0xcc   : > { %555 = vtanh.f32 %v363_v38 }
  0xd4   : > { %v554_v35 = vpop.eup %553 }
  0xd5   : > { %v368_v39 = vmul.f32 0.5, %v554_v35 }
  0xd6   : > { %v556_v7 = vpop.eup %555 }
  0xd7   : > { %v367_v40 = vmul.f32 0.5, %v556_v7  ;;  %v370_v31 = vadd.f32 0.5, %v368_v39  ;;  %381 = sbr.rel (!%p796_p4) target bundleno = 230 (0xe6), region = 78 }
  0xd9   : > { %v369_v41 = vadd.f32 0.5, %v367_v40  ;;  %v372_v42 = vmul.f32 %v370_v31, %v362_v28 }
  0xdb   : > { %v371_v43 = vmul.f32 %v369_v41, %v361_v36  ;;  %374 = vst [vmem:[%s217_s28 + $0x8] sm:$0xff] %v372_v42 }
  0xdd   : > { %373 = vst [vmem:[%s217_s28] sm:$0xff] %v371_v43 }
  0xe2   : > { %v415_v45 = vld [vmem:[%s217_s28 + $0x8] sm:$0xff] }
  0xe3   : > { %416 = vst [vmem:[%s383_s5 + $0x10] sm:$0xff] %v415_v45 }
  0xe4   : > { %v413_v44 = vld [vmem:[%s217_s28] sm:$0xff] }
  0xe5   : > { %414 = vst [vmem:[%s383_s5] sm:$0xff] %v413_v44 }
  0xe6 PF: > { %p12_p5 = scmp.ge.s32.totalorder %s646_s17, 4   ;;  %s797_s14 = smov %s594_s15 }
  0xe7   : > { %s798_s15 = smov %s656_s20  ;;  %s799_s16 = smov %s646_s17 }
  0xe8   :  { %14 = sbr.rel (!%p12_p5) target bundleno = 4 (0x4), region = 148 }
  0xef   :  { %432 = vsyncpa [#allocation4], 1 }
  0xf0   :  { %434 = vsyncpa [#allocation4 + $0x1], 1 }

</bundles_post_ra>
